<compile_context>
chip_gen: v7x
topology: tpu7x:2x2x1
jax: 0.10.0
libtpu: 0.0.40
codegen_flags: <defaults>
</compile_context>

<pallas_src>
import jax
import jax.numpy as jnp
from jax.experimental import pallas as pl
from jax.experimental.pallas import tpu as pltpu


def _round_up(n, m):
    return ((n + m - 1) // m) * m


def dqn_mlp_kernel(x_ref,
                   w1_ref, b1_ref,
                   w2_ref, b2_ref,
                   w3_ref, b3_ref,
                   w4_ref, b4_ref,
                   o_ref):
    """Fused 4-layer MLP forward: (Linear -> ReLU) x3 -> Linear.

    x_ref and all w*_ref are bf16 (MXU-rate inputs); accumulation, bias-add
    and ReLU are f32; output is bf16 (lane-padded to 128 columns so the store
    is a dense, unmasked vst).
    """
    h = jnp.dot(x_ref[...], w1_ref[...], preferred_element_type=jnp.float32)
    h = jnp.maximum(h + b1_ref[...], 0.0)

    h = jnp.dot(h.astype(jnp.bfloat16), w2_ref[...],
                preferred_element_type=jnp.float32)
    h = jnp.maximum(h + b2_ref[...], 0.0)

    h = jnp.dot(h.astype(jnp.bfloat16), w3_ref[...],
                preferred_element_type=jnp.float32)
    h = jnp.maximum(h + b3_ref[...], 0.0)

    out = jnp.dot(h.astype(jnp.bfloat16), w4_ref[...],
                  preferred_element_type=jnp.float32)
    o_ref[...] = (out + b4_ref[...]).astype(o_ref.dtype)


def _pad_params_lane_dense(params, state_dim):
    """Zero-pads every layer's output width (and the next layer's input rows)
    up to a multiple of 128 so all intermediates are full 128-lane slabs.
    Exact identity on the forward pass."""
    padded = []
    prev_in = state_dim  # x itself is not padded along features
    for (w, b) in params:
        in_d, out_d = w.shape
        out_p = _round_up(out_d, 128)
        wp = jnp.pad(w, ((0, prev_in - in_d), (0, out_p - out_d)))
        bp = jnp.pad(b, ((0, 0), (0, out_p - out_d)))
        padded.append((wp, bp))
        prev_in = out_p
    return padded


def dqn_forward(x, params, *, block_batch=2048):
    """Runs the DQN MLP forward pass with a fused Pallas kernel.

    Args:
      x: [batch, state_dim] activations (any float dtype; cast to bf16 for
         the MXU inside the wrapper).
      params: list of 4 (W, b) tuples; W: bf16 [in_dim, out_dim], b: f32
         [1, out_dim].
      block_batch: requested batch tile size (multiple of 8; default 2048).

    Returns:
      [batch, action_dim] float32 Q-values.
    """
    batch, state_dim = x.shape
    action_dim = params[-1][0].shape[1]

    # Pad all layer widths to multiples of 128 (lane-dense intermediates and
    # lane-dense output writeback).
    (w1, b1), (w2, b2), (w3, b3), (w4, b4) = _pad_params_lane_dense(
        params, state_dim)
    out_pad = w4.shape[1]

    # ---- batch tile selection -------------------------------------------
    padded_batch8 = _round_up(batch, 8)

    # VMEM-aware cap: x tile (bf16, 2 bufs) + out tile (bf16, 2 bufs) + a few
    # f32 hidden slabs.  Keep well under the 32 MiB limit we request below.
    bytes_per_row = (2 * 2 * state_dim          # x, double-buffered, bf16
                     + 2 * 2 * out_pad          # out, double-buffered, bf16
                     + 4 * 4 * 128)             # f32 hidden slabs (headroom)
    vmem_budget = 24 * 1024 * 1024
    bm_cap = max(8, (vmem_budget // bytes_per_row) // 8 * 8)

    bm = min(block_batch, bm_cap, padded_batch8)
    bm = max(8, (bm // 8) * 8)

    # v7x megacore: keep >= 2 grid steps when the batch is large enough so a
    # single giant tile does not leave the second TensorCore idle.  (On
    # v5e/v6e this costs at most one ~0.35 us pipeline step.)
    if padded_batch8 >= 1024:
        half = max(8, ((padded_batch8 // 2) // 8) * 8)
        bm = min(bm, half)

    padded_batch = _round_up(padded_batch8, bm)
    grid = (padded_batch // bm,)

    xp = jnp.pad(x, ((0, padded_batch - batch), (0, 0))).astype(jnp.bfloat16)

    # ---- specs ------------------------------------------------------------
    def full_spec(arr):
        # Whole-array block, same block every grid step (stays VMEM-resident).
        return pl.BlockSpec(arr.shape, lambda i, nd=arr.ndim: (0,) * nd)

    in_specs = [
        pl.BlockSpec((bm, state_dim), lambda i: (i, 0)),   # x tile over batch
        full_spec(w1), full_spec(b1),
        full_spec(w2), full_spec(b2),
        full_spec(w3), full_spec(b3),
        full_spec(w4), full_spec(b4),
    ]
    out_specs = pl.BlockSpec((bm, out_pad), lambda i: (i, 0))

    # Advisory cost estimate so XLA schedules around the custom call.
    dims = [state_dim, w1.shape[1], w2.shape[1], w3.shape[1], out_pad]
    flops = 2 * padded_batch * sum(a * b for a, b in zip(dims[:-1], dims[1:]))
    bytes_accessed = (
        xp.size * 2
        + sum(w.size * 2 + b.size * 4
              for (w, b) in [(w1, b1), (w2, b2), (w3, b3), (w4, b4)])
        + padded_batch * out_pad * 2)   # bf16 writeback

    out = pl.pallas_call(
        dqn_mlp_kernel,
        out_shape=jax.ShapeDtypeStruct((padded_batch, out_pad), jnp.bfloat16),
        grid_spec=pltpu.PrefetchScalarGridSpec(
            num_scalar_prefetch=0,
            grid=grid,
            in_specs=in_specs,
            out_specs=out_specs,
        ),
        compiler_params=pltpu.CompilerParams(
            dimension_semantics=("parallel",),
            vmem_limit_bytes=32 * 1024 * 1024),
        cost_estimate=pl.CostEstimate(
            flops=flops, transcendentals=0, bytes_accessed=bytes_accessed),
    )(xp, w1, b1, w2, b2, w3, b3, w4, b4)

    return out[:batch, :action_dim].astype(jnp.float32)


def init_params(key, state_dim, action_dim, hidden_dims):
    """PyTorch-style uniform init. W stored bf16 [in, out]; b stored f32."""
    dims = [state_dim] + list(hidden_dims) + [action_dim]
    params = []
    for i in range(len(dims) - 1):
        in_d, out_d = dims[i], dims[i + 1]
        key, kw, kb = jax.random.split(key, 3)
        bound = 1.0 / jnp.sqrt(jnp.float32(in_d))
        w = jax.random.uniform(kw, (in_d, out_d), jnp.float32, -bound, bound)
        b = jax.random.uniform(kb, (1, out_d), jnp.float32, -bound, bound)
        params.append((w.astype(jnp.bfloat16), b))
    return params


def reference_forward(x, params):
    """Plain-JAX reference mimicking the kernel's numerics: bf16-rounded dot
    inputs, f32 accumulation, f32 bias-add / ReLU (eval-mode dropout).  Not
    bit-identical to the kernel (true bf16 MXU matmul, bf16 output store) --
    covered by the loose tolerance below."""
    h = x.astype(jnp.float32)
    for i, (w, b) in enumerate(params):
        h = jnp.dot(h.astype(jnp.bfloat16).astype(jnp.float32),
                    w.astype(jnp.float32)) + b
        if i < len(params) - 1:
            h = jnp.maximum(h, 0.0)
    return h


if __name__ == "__main__":
    state_dim = 32
    action_dim = 8
    hidden_dims = [128, 64, 32]
    batch = 64

    key = jax.random.PRNGKey(0)
    key, kx = jax.random.split(key)
    x = jax.random.normal(kx, (batch, state_dim), jnp.float32)

    params = init_params(key, state_dim, action_dim, hidden_dims)

    out = dqn_forward(x, params)
    out = jax.block_until_ready(out)

    ref = reference_forward(x, params)
    assert out.shape == (batch, action_dim)
    assert jnp.allclose(out, ref, atol=2e-2, rtol=2e-2)

    print("KERNEL_OK")
</pallas_src>

<mosaic_0001>
module attributes {stable_mosaic.version = 11 : i64} {
  func.func @dqn_mlp_kernel(%arg0: i32, %arg1: memref<64x32xbf16, #tpu.memory_space<vmem>>, %arg2: memref<32x128xbf16, #tpu.memory_space<vmem>>, %arg3: memref<1x128xf32, #tpu.memory_space<vmem>>, %arg4: memref<128x128xbf16, #tpu.memory_space<vmem>>, %arg5: memref<1x128xf32, #tpu.memory_space<vmem>>, %arg6: memref<128x128xbf16, #tpu.memory_space<vmem>>, %arg7: memref<1x128xf32, #tpu.memory_space<vmem>>, %arg8: memref<128x128xbf16, #tpu.memory_space<vmem>>, %arg9: memref<1x128xf32, #tpu.memory_space<vmem>>, %arg10: memref<64x128xbf16, #tpu.memory_space<vmem>>) attributes {dimension_semantics = [#tpu.dimension_semantics<parallel>], iteration_bounds = array<i64: 1>, scalar_prefetch = 0 : i64, scratch_operands = 0 : i64, tpu.core_type = #tpu.core_type<tc>, window_params = [{transform_indices = @transform_0, window_bounds = array<i64: 64, 32>}, {pipeline_mode = #tpu.pipeline_mode<synchronous>, transform_indices = @transform_1, window_bounds = array<i64: 32, 128>}, {pipeline_mode = #tpu.pipeline_mode<synchronous>, transform_indices = @transform_2, window_bounds = array<i64: 1, 128>}, {pipeline_mode = #tpu.pipeline_mode<synchronous>, transform_indices = @transform_3, window_bounds = array<i64: 128, 128>}, {pipeline_mode = #tpu.pipeline_mode<synchronous>, transform_indices = @transform_4, window_bounds = array<i64: 1, 128>}, {pipeline_mode = #tpu.pipeline_mode<synchronous>, transform_indices = @transform_5, window_bounds = array<i64: 128, 128>}, {pipeline_mode = #tpu.pipeline_mode<synchronous>, transform_indices = @transform_6, window_bounds = array<i64: 1, 128>}, {pipeline_mode = #tpu.pipeline_mode<synchronous>, transform_indices = @transform_7, window_bounds = array<i64: 128, 128>}, {pipeline_mode = #tpu.pipeline_mode<synchronous>, transform_indices = @transform_8, window_bounds = array<i64: 1, 128>}, {transform_indices = @transform_9, window_bounds = array<i64: 64, 128>}]} {
    %c0 = arith.constant 0 : index
    %c0_0 = arith.constant 0 : index
    %0 = vector.load %arg1[%c0, %c0_0] : memref<64x32xbf16, #tpu.memory_space<vmem>>, vector<64x32xbf16>
    %c0_1 = arith.constant 0 : index
    %c0_2 = arith.constant 0 : index
    %1 = vector.load %arg2[%c0_1, %c0_2] : memref<32x128xbf16, #tpu.memory_space<vmem>>, vector<32x128xbf16>
    %cst = arith.constant dense<0.000000e+00> : vector<64x128xf32>
    %2 = tpu.matmul %0, %1, %cst {dimension_numbers = #tpu.dot_dimension_numbers<[1], [0], [0], [1], [0, 0, 1, 1], [], []>} : vector<64x32xbf16>, vector<32x128xbf16>, vector<64x128xf32> -> vector<64x128xf32>
    %c0_3 = arith.constant 0 : index
    %c0_4 = arith.constant 0 : index
    %3 = vector.load %arg3[%c0_3, %c0_4] : memref<1x128xf32, #tpu.memory_space<vmem>>, vector<1x128xf32>
    %4 = vector.broadcast %3 : vector<1x128xf32> to vector<64x128xf32>
    %5 = arith.addf %2, %4 : vector<64x128xf32>
    %cst_5 = arith.constant 0.000000e+00 : f32
    %6 = vector.broadcast %cst_5 : f32 to vector<64x128xf32>
    %7 = arith.maximumf %5, %6 : vector<64x128xf32>
    %8 = arith.truncf %7 : vector<64x128xf32> to vector<64x128xbf16>
    %c0_6 = arith.constant 0 : index
    %c0_7 = arith.constant 0 : index
    %9 = vector.load %arg4[%c0_6, %c0_7] : memref<128x128xbf16, #tpu.memory_space<vmem>>, vector<128x128xbf16>
    %cst_8 = arith.constant dense<0.000000e+00> : vector<64x128xf32>
    %10 = tpu.matmul %8, %9, %cst_8 {dimension_numbers = #tpu.dot_dimension_numbers<[1], [0], [0], [1], [0, 0, 1, 1], [], []>} : vector<64x128xbf16>, vector<128x128xbf16>, vector<64x128xf32> -> vector<64x128xf32>
    %c0_9 = arith.constant 0 : index
    %c0_10 = arith.constant 0 : index
    %11 = vector.load %arg5[%c0_9, %c0_10] : memref<1x128xf32, #tpu.memory_space<vmem>>, vector<1x128xf32>
    %12 = vector.broadcast %11 : vector<1x128xf32> to vector<64x128xf32>
    %13 = arith.addf %10, %12 : vector<64x128xf32>
    %cst_11 = arith.constant 0.000000e+00 : f32
    %14 = vector.broadcast %cst_11 : f32 to vector<64x128xf32>
    %15 = arith.maximumf %13, %14 : vector<64x128xf32>
    %16 = arith.truncf %15 : vector<64x128xf32> to vector<64x128xbf16>
    %c0_12 = arith.constant 0 : index
    %c0_13 = arith.constant 0 : index
    %17 = vector.load %arg6[%c0_12, %c0_13] : memref<128x128xbf16, #tpu.memory_space<vmem>>, vector<128x128xbf16>
    %cst_14 = arith.constant dense<0.000000e+00> : vector<64x128xf32>
    %18 = tpu.matmul %16, %17, %cst_14 {dimension_numbers = #tpu.dot_dimension_numbers<[1], [0], [0], [1], [0, 0, 1, 1], [], []>} : vector<64x128xbf16>, vector<128x128xbf16>, vector<64x128xf32> -> vector<64x128xf32>
    %c0_15 = arith.constant 0 : index
    %c0_16 = arith.constant 0 : index
    %19 = vector.load %arg7[%c0_15, %c0_16] : memref<1x128xf32, #tpu.memory_space<vmem>>, vector<1x128xf32>
    %20 = vector.broadcast %19 : vector<1x128xf32> to vector<64x128xf32>
    %21 = arith.addf %18, %20 : vector<64x128xf32>
    %cst_17 = arith.constant 0.000000e+00 : f32
    %22 = vector.broadcast %cst_17 : f32 to vector<64x128xf32>
    %23 = arith.maximumf %21, %22 : vector<64x128xf32>
    %24 = arith.truncf %23 : vector<64x128xf32> to vector<64x128xbf16>
    %c0_18 = arith.constant 0 : index
    %c0_19 = arith.constant 0 : index
    %25 = vector.load %arg8[%c0_18, %c0_19] : memref<128x128xbf16, #tpu.memory_space<vmem>>, vector<128x128xbf16>
    %cst_20 = arith.constant dense<0.000000e+00> : vector<64x128xf32>
    %26 = tpu.matmul %24, %25, %cst_20 {dimension_numbers = #tpu.dot_dimension_numbers<[1], [0], [0], [1], [0, 0, 1, 1], [], []>} : vector<64x128xbf16>, vector<128x128xbf16>, vector<64x128xf32> -> vector<64x128xf32>
    %c0_21 = arith.constant 0 : index
    %c0_22 = arith.constant 0 : index
    %27 = vector.load %arg9[%c0_21, %c0_22] : memref<1x128xf32, #tpu.memory_space<vmem>>, vector<1x128xf32>
    %28 = vector.broadcast %27 : vector<1x128xf32> to vector<64x128xf32>
    %29 = arith.addf %26, %28 : vector<64x128xf32>
    %30 = arith.truncf %29 : vector<64x128xf32> to vector<64x128xbf16>
    %c0_23 = arith.constant 0 : index
    %c0_24 = arith.constant 0 : index
    %31 = vector.load %arg10[%c0_23, %c0_24] : memref<64x128xbf16, #tpu.memory_space<vmem>>, vector<64x128xbf16>
    tpu.vector_store %arg10[%c0_23, %c0_24], %30 {strides = array<i32>} : memref<64x128xbf16, #tpu.memory_space<vmem>>, vector<64x128xbf16>,
    return
  }
  func.func @transform_0(%arg0: i32) -> (i32, i32) {
    %c0_i32 = arith.constant 0 : i32
    %c0_i32_0 = arith.constant 0 : i32
    return %arg0, %c0_i32 : i32, i32
  }
  func.func @transform_1(%arg0: i32) -> (i32, i32) {
    %c0_i32 = arith.constant 0 : i32
    %c0_i32_0 = arith.constant 0 : i32
    %c0_i32_1 = arith.constant 0 : i32
    return %c0_i32, %c0_i32_0 : i32, i32
  }
  func.func @transform_2(%arg0: i32) -> (i32, i32) {
    %c0_i32 = arith.constant 0 : i32
    %c0_i32_0 = arith.constant 0 : i32
    %c0_i32_1 = arith.constant 0 : i32
    return %c0_i32, %c0_i32_0 : i32, i32
  }
  func.func @transform_3(%arg0: i32) -> (i32, i32) {
    %c0_i32 = arith.constant 0 : i32
    %c0_i32_0 = arith.constant 0 : i32
    %c0_i32_1 = arith.constant 0 : i32
    return %c0_i32, %c0_i32_0 : i32, i32
  }
  func.func @transform_4(%arg0: i32) -> (i32, i32) {
    %c0_i32 = arith.constant 0 : i32
    %c0_i32_0 = arith.constant 0 : i32
    %c0_i32_1 = arith.constant 0 : i32
    return %c0_i32, %c0_i32_0 : i32, i32
  }
  func.func @transform_5(%arg0: i32) -> (i32, i32) {
    %c0_i32 = arith.constant 0 : i32
    %c0_i32_0 = arith.constant 0 : i32
    %c0_i32_1 = arith.constant 0 : i32
    return %c0_i32, %c0_i32_0 : i32, i32
  }
  func.func @transform_6(%arg0: i32) -> (i32, i32) {
    %c0_i32 = arith.constant 0 : i32
    %c0_i32_0 = arith.constant 0 : i32
    %c0_i32_1 = arith.constant 0 : i32
    return %c0_i32, %c0_i32_0 : i32, i32
  }
  func.func @transform_7(%arg0: i32) -> (i32, i32) {
    %c0_i32 = arith.constant 0 : i32
    %c0_i32_0 = arith.constant 0 : i32
    %c0_i32_1 = arith.constant 0 : i32
    return %c0_i32, %c0_i32_0 : i32, i32
  }
  func.func @transform_8(%arg0: i32) -> (i32, i32) {
    %c0_i32 = arith.constant 0 : i32
    %c0_i32_0 = arith.constant 0 : i32
    %c0_i32_1 = arith.constant 0 : i32
    return %c0_i32, %c0_i32_0 : i32, i32
  }
  func.func @transform_9(%arg0: i32) -> (i32, i32) {
    %c0_i32 = arith.constant 0 : i32
    %c0_i32_0 = arith.constant 0 : i32
    return %arg0, %c0_i32 : i32, i32
  }
}

</mosaic_0001>

<bundles_post_ra>
// kernel: tpu_custom_call.1
= control target key start
LH: loop header
LB: loop body
LE: loop exit
PB: predicated region body
PF: predicated region fallthrough
CT: control target
= control target key end

     0   :  { %14 = vsyncpa [#allocation3], 0  ;;  %s1214_s0 = inlined_call_operand.vmem [shape: bf16[64,32], index: 0, kind: input, shape index: {}]   ;;  %s1215_s1 = inlined_call_operand.hbm [shape: bf16[32,128], index: 1, kind: input, shape index: {}]   ;;  %s1216_s2 = inlined_call_operand.vmem [shape: f32[1,128], index: 2, kind: input, shape index: {}]   ;;  %s1217_s3 = inlined_call_operand.hbm [shape: bf16[128,128], index: 3, kind: input, shape index: {}]   ;;  %s1218_s4 = inlined_call_operand.vmem [shape: f32[1,128], index: 4, kind: input, shape index: {}]   ;;  %s1219_s5 = inlined_call_operand.vmem [shape: bf16[128,128], index: 5, kind: input, shape index: {}]   ;;  %s1220_s6 = inlined_call_operand.vmem [shape: f32[1,128], index: 6, kind: input, shape index: {}]   ;;  %s1221_s7 = inlined_call_operand.hbm [shape: bf16[128,128], index: 7, kind: input, shape index: {}]   ;;  %s1222_s8 = inlined_call_operand.vmem [shape: f32[1,128], index: 8, kind: input, shape index: {}]   ;;  %s1223_s9 = inlined_call_operand.hbm [shape: bf16[64,128], index: 9, kind: output, shape index: {}]  }
   0x1   :  { %15 = vsyncpa [#allocation6], 0 }
   0x2   :  { %16 = vsyncpa [#allocation4], 0  ;;  %s1039_s30 = smov [#allocation5]   ;;  %s1040_s11 = smov [#allocation2]  }
   0x3   :  { %s38_s10 = sshll.u32 %s1039_s30, 4  ;;  %s24_s12 = sshll.u32 %s1040_s11, 4  ;;  %s39_s10 = int_to_ptr.vmem [resolvable:$true] %s38_s10  ;;  %s1095_s12 = int_to_ptr.vmem [resolvable:$true] %s24_s12 }
   0x4   :  { %s945_s15 = scalar_lea.hbm %s1217_s3, 1024 }
   0x5   :  { %p946_p0 = scmp.ne.s32.totalorder %s1217_s3, %s945_s15  ;;  %p949_p1 = scmp.lt.u32.totalorder %s945_s15, %s1217_s3 }
   0x7   :  { %p951_p2 = pnand %p949_p1, %p946_p0 }
   0x9   :  { %954 = shalt.err (!%p951_p2)
}
   0xa   :  { %s955_s20 = scalar_lea.vmem %s39_s10, 1024  ;;  %p960_p4 = scmp.lt.s32.totalorder %s39_s10, %s39_s10 }
   0xb   :  { %p956_p3 = scmp.ne.s32.totalorder %s39_s10, %s955_s20  ;;  %p961_p5 = scmp.lt.s32.totalorder %s955_s20, %s955_s20 }
   0xd   :  { %p962_p6 = por %p961_p5, %p960_p4 }
   0xf   :  { %p963_p7 = pnand %p962_p6, %p956_p3 }
  0x11   :  { %966 = shalt.err (!%p963_p7)
}
  0x12   :  { %s1041_s21 = smov 64   ;;  %s1042_s22 = smov 4  }
  0x13   :  { %44 = dma.hbm_to_vmem [thread:$0]  %s1217_s3, 1024, %s39_s10, [#allocation6], %s1041_s21, %s1041_s21, %s1042_s22  }
  0x14   :  { %s967_s27 = scalar_lea.hbm %s1215_s1, 256 }
  0x15   :  { %p968_p8 = scmp.ne.s32.totalorder %s1215_s1, %s967_s27  ;;  %p971_p9 = scmp.lt.u32.totalorder %s967_s27, %s1215_s1 }
  0x17   :  { %p973_p10 = pnand %p971_p9, %p968_p8 }
  0x19   :  { %976 = shalt.err (!%p973_p10)
}
  0x1a   :  { %s977_s13 = scalar_lea.vmem %s1095_s12, 256  ;;  %p982_p12 = scmp.lt.s32.totalorder %s1095_s12, %s1095_s12 }
  0x1b   :  { %p978_p11 = scmp.ne.s32.totalorder %s1095_s12, %s977_s13  ;;  %p983_p13 = scmp.lt.s32.totalorder %s977_s13, %s977_s13 }
  0x1d   :  { %p984_p0 = por %p983_p13, %p982_p12 }
  0x1f   :  { %p985_p1 = pnand %p984_p0, %p978_p11 }
  0x21   :  { %988 = shalt.err (!%p985_p1)
}
  0x22   :  { %30 = dma.hbm_to_vmem [thread:$0]  %s1215_s1, 256, %s1095_s12, [#allocation3], %s1041_s21, %s1041_s21, %s1042_s22  }
  0x23   :  { %s1043_s14 = smov [#allocation7]   ;;  %s989_s18 = scalar_lea.hbm %s1221_s7, 1024 }
  0x24   :  { %s56_s15 = sshll.u32 %s1043_s14, 4  ;;  %p990_p2 = scmp.ne.s32.totalorder %s1221_s7, %s989_s18  ;;  %s57_s15 = int_to_ptr.vmem [resolvable:$true] %s56_s15 }
  0x25   :  { %p993_p3 = scmp.lt.u32.totalorder %s989_s18, %s1221_s7 }
  0x27   :  { %p995_p4 = pnand %p993_p3, %p990_p2 }
  0x29   :  { %998 = shalt.err (!%p995_p4)
}
  0x2a   :  { %s999_s25 = scalar_lea.vmem %s57_s15, 1024  ;;  %p1004_p6 = scmp.lt.s32.totalorder %s57_s15, %s57_s15 }
  0x2b   :  { %p1000_p5 = scmp.ne.s32.totalorder %s57_s15, %s999_s25  ;;  %p1005_p7 = scmp.lt.s32.totalorder %s999_s25, %s999_s25 }
  0x2d   :  { %p1006_p8 = por %p1005_p7, %p1004_p6 }
  0x2f   :  { %p1007_p9 = pnand %p1006_p8, %p1000_p5 }
  0x31   :  { %1010 = shalt.err (!%p1007_p9)
}
  0x32   :  { %62 = dma.hbm_to_vmem [thread:$0]  %s1221_s7, 1024, %s57_s15, [#allocation6], %s1041_s21, %s1041_s21, %s1042_s22  }
  0x33   :  { %1033 = dma.done.wait [#allocation3], 256  }
  0x34   :  { %1034 = vsyncadd [#allocation3], 4294967040 }
  0x35   :  { %1035 = dma.done.wait [#allocation6], 2048  }
  0x36   :  { %1036 = vsyncadd [#allocation6], 4294965248  ;;  %v915_v0 = vld [vmem:[#allocation2] sm:$0xff]   ;;  %v916_v1 = vld [vmem:[#allocation2 + $0x8] sm:$0xff]   ;;  %vm126_vm0 = vcmask 261120   ;;  %s1044_s30 = smov [#allocation8]  }
  0x37   :  { %825 = vmatprep.subr.bf16.mxu0 %v915_v0  ;;  %v917_v2 = vld [vmem:[%s1214_s0] sm:$0xff]   ;;  %v918_v3 = vld [vmem:[%s1214_s0 + $0x8] sm:$0xff]   ;;  %v919_v4 = vld [vmem:[%s1214_s0 + $0x10] sm:$0xff]   ;;  %s693_s11 = sshll.u32 %s1044_s30, 4  ;;  %s694_s11 = int_to_ptr.vmem [resolvable:$true] %s693_s11 }
  0x38   :  { %826 = vmatpush3.bf16.msra.mxu0 %v915_v0  ;;  %829 = vmatprep.mubr.msk.bf16.mxu0 %vm126_vm0, %v917_v2  ;;  %v921_v5 = vld [vmem:[#allocation5] sm:$0xff]   ;;  %v922_v6 = vld [vmem:[#allocation5 + $0x8] sm:$0xff]   ;;  %v923_v7 = vld [vmem:[#allocation5 + $0x10] sm:$0xff]   ;;  %p1016_p11 = scmp.lt.s32.totalorder %s694_s11, %s694_s11 }
  0x39   :  { %827 = vmatprep.subr.bf16.mxu0 %v916_v1  ;;  %837 = vmatprep.subr.bf16.mxu1 %v921_v5  ;;  %v920_v8 = vld [vmem:[%s1214_s0 + $0x18] sm:$0xff]   ;;  %v924_v9 = vld [vmem:[#allocation5 + $0x18] sm:$0xff]   ;;  %v925_v10 = vld [vmem:[#allocation5 + $0x20] sm:$0xff]  }
  0x3a   :  { %838 = vmatpush3.bf16.msra.mxu1 %v921_v5  ;;  %v926_v11 = vld [vmem:[#allocation5 + $0x28] sm:$0xff]   ;;  %v927_v12 = vld [vmem:[#allocation5 + $0x30] sm:$0xff]   ;;  %v928_v13 = vld [vmem:[#allocation5 + $0x38] sm:$0xff]  }
  0x3b   :  { %839 = vmatprep.subr.bf16.mxu1 %v922_v6  ;;  %v929_v14 = vld [vmem:[%s1219_s5] sm:$0xff]   ;;  %v930_v15 = vld [vmem:[%s1219_s5 + $0x8] sm:$0xff]   ;;  %v931_v16 = vld [vmem:[%s1219_s5 + $0x10] sm:$0xff]  }
  0x3c   :  { %828 = vmatpush3.bf16.msra.mxu0 %v916_v1  ;;  %v932_v17 = vld [vmem:[%s1219_s5 + $0x18] sm:$0xff]   ;;  %v933_v18 = vld [vmem:[%s1219_s5 + $0x20] sm:$0xff]   ;;  %v934_v19 = vld [vmem:[%s1219_s5 + $0x28] sm:$0xff]  }
  0x3d   :  { %861 = vmatprep.subr.bf16.mxu0 %v929_v14  ;;  %v706_v20 = vld [vmem:[%s1216_s2] ss:$0 sm:$0xff]  ;;  %v935_v49 = vld [vmem:[%s1219_s5 + $0x30] sm:$0xff]   ;;  %v936_v50 = vld [vmem:[%s1219_s5 + $0x38] sm:$0xff]  }
  0x3e   :  { %840 = vmatpush3.bf16.msra.mxu1 %v922_v6  ;;  %v937_v51 = vld [vmem:[#allocation7] sm:$0xff]   ;;  %v938_v52 = vld [vmem:[#allocation7 + $0x8] sm:$0xff]   ;;  %v939_v53 = vld [vmem:[#allocation7 + $0x10] sm:$0xff]  }
  0x3f   :  { %830 = vmatmul.mubr.msk.bf16.vlgmr.msra.gmra.mrb[0].mxu0 %vm126_vm0, %v918_v3  ;;  %841 = vmatprep.subr.bf16.mxu1 %v923_v7  ;;  %v940_v54 = vld [vmem:[#allocation7 + $0x18] sm:$0xff]   ;;  %v941_v55 = vld [vmem:[#allocation7 + $0x20] sm:$0xff]   ;;  %v942_v56 = vld [vmem:[#allocation7 + $0x28] sm:$0xff]  }
  0x40   :  { %833 = vmatprep.mubr.msk.bf16.mxu0 %vm126_vm0, %v919_v4  ;;  %862 = vmatpush3.bf16.msra.mxu0 %v929_v14  ;;  %v717_v57 = vld [vmem:[%s1218_s4] ss:$0 sm:$0xff] }
  0x41   :  { %863 = vmatprep.subr.bf16.mxu0 %v930_v15 }
  0x42   :  { %842 = vmatpush3.bf16.msra.mxu1 %v923_v7 }
  0x43   :  { %843 = vmatprep.subr.bf16.mxu1 %v924_v9 }
  0x44   :  { %864 = vmatpush3.bf16.msra.mxu0 %v930_v15 }
  0x45   :  { %865 = vmatprep.subr.bf16.mxu0 %v931_v16 }
  0x46   :  { %844 = vmatpush3.bf16.msra.mxu1 %v924_v9 }
  0x47   :  { %834 = vmatmul.mubr.msk.bf16.gmra.mrb[4].mxu0 %vm126_vm0, %v920_v8  ;;  %845 = vmatprep.subr.bf16.mxu1 %v925_v10 }
  0x48   :  { %866 = vmatpush3.bf16.msra.mxu0 %v931_v16 }
  0x49   :  { %867 = vmatprep.subr.bf16.mxu0 %v932_v17 }
  0x4a   :  { %846 = vmatpush3.bf16.msra.mxu1 %v925_v10 }
  0x4b   :  { %847 = vmatprep.subr.bf16.mxu1 %v926_v11 }
  0x4c   :  { %868 = vmatpush3.bf16.msra.mxu0 %v932_v17 }
  0x4d   :  { %869 = vmatprep.subr.bf16.mxu0 %v933_v18 }
  0x4e   :  { %848 = vmatpush3.bf16.msra.mxu1 %v926_v11 }
  0x4f   :  { %849 = vmatprep.subr.bf16.mxu1 %v927_v12 }
  0x50   :  { %870 = vmatpush3.bf16.msra.mxu0 %v933_v18 }
  0x51   :  { %871 = vmatprep.subr.bf16.mxu0 %v934_v19 }
  0x52   :  { %850 = vmatpush3.bf16.msra.mxu1 %v927_v12 }
  0x53   :  { %851 = vmatprep.subr.bf16.mxu1 %v928_v13 }
  0x54   :  { %872 = vmatpush3.bf16.msra.mxu0 %v934_v19 }
  0x55   :  { %873 = vmatprep.subr.bf16.mxu0 %v935_v49 }
  0x56   :  { %852 = vmatpush3.bf16.msra.mxu1 %v928_v13 }
  0x57   :  { %885 = vmatprep.subr.bf16.mxu1 %v937_v51 }
  0x58   :  { %874 = vmatpush3.bf16.msra.mxu0 %v935_v49 }
  0x59   :  { %875 = vmatprep.subr.bf16.mxu0 %v936_v50 }
  0x5c   :  { %876 = vmatpush3.bf16.msra.mxu0 %v936_v50 }
 0x112   :  { %v831_v21 = vpop.f32.mrb[0].mxu0 }
 0x113   :  { %v182_v22 = vadd.f32 %v831_v21, %v706_v20  ;;  %v173_v23 = vpop.f32.mrb[1].mxu0 }
 0x114   :  { %v174_v24 = vadd.f32 %v706_v20, %v173_v23  ;;  %v832_v25 = vpop.f32.mrb[2].mxu0  ;;  %v944_v23 = vld [vmem:[#allocation7 + $0x38] sm:$0xff]  }
 0x115   :  { %v185_v26 = vadd.f32 %v832_v25, %v706_v20  ;;  %v176_v27 = vpop.f32.mrb[3].mxu0  ;;  %v206_v29 = vmax.f32 %v182_v22, 0.0  ;;  %v943_v22 = vld [vmem:[#allocation7 + $0x30] sm:$0xff]  }
 0x116   :  { %v177_v28 = vadd.f32 %v706_v20, %v176_v27  ;;  %v204_v31 = vmax.f32 %v174_v24, 0.0  ;;  %v726_v24 = vld [vmem:[%s1220_s6] ss:$0 sm:$0xff] }
 0x117   :  { %v207_v30 = vmax.f32 %v185_v26, 0.0 }
 0x118   :  { %v205_v32 = vmax.f32 %v177_v28, 0.0 }
 0x119   :  { %v213_v33 = vpack.c.bf16 %v207_v30, %v206_v29 }
 0x11a   :  { %v835_v34 = vpop.f32.mrb[4].mxu0  ;;  %v212_v35 = vpack.c.bf16 %v205_v32, %v204_v31 }
 0x11b   :  { %v198_v36 = vadd.f32 %v835_v34, %v706_v20  ;;  %v189_v37 = vpop.f32.mrb[5].mxu0 }
 0x11c   :  { %v190_v38 = vadd.f32 %v706_v20, %v189_v37  ;;  %v836_v39 = vpop.f32.mrb[6].mxu0  ;;  %853 = vmatprep.mubr.bf16.mxu1 %v212_v35 }
 0x11d   :  { %v201_v40 = vadd.f32 %v836_v39, %v706_v20  ;;  %v192_v41 = vpop.f32.mrb[7].mxu0  ;;  %854 = vmatmul.mubr.bf16.vlgmr.msra.gmra.mrb[0].mxu1 %v213_v33  ;;  %v210_v43 = vmax.f32 %v198_v36, 0.0 }
 0x11e   :  { %v193_v42 = vadd.f32 %v706_v20, %v192_v41  ;;  %v208_v45 = vmax.f32 %v190_v38, 0.0  ;;  %886 = vmatpush3.bf16.msra.mxu1 %v937_v51 }
 0x11f   :  { %v211_v44 = vmax.f32 %v201_v40, 0.0  ;;  %887 = vmatprep.subr.bf16.mxu1 %v938_v52 }
 0x120   :  { %v209_v46 = vmax.f32 %v193_v42, 0.0 }
 0x121   :  { %v215_v47 = vpack.c.bf16 %v211_v44, %v210_v43 }
 0x122   :  { %v214_v48 = vpack.c.bf16 %v209_v46, %v208_v45  ;;  %888 = vmatpush3.bf16.msra.mxu1 %v938_v52 }
 0x123   :  { %889 = vmatprep.subr.bf16.mxu1 %v939_v53 }
 0x124   :  { %857 = vmatprep.mubr.bf16.mxu1 %v214_v48 }
 0x125   :  { %858 = vmatmul.mubr.bf16.gmra.mrb[4].mxu1 %v215_v47 }
 0x126   :  { %890 = vmatpush3.bf16.msra.mxu1 %v939_v53 }
 0x127   :  { %891 = vmatprep.subr.bf16.mxu1 %v940_v54 }
 0x12a   :  { %892 = vmatpush3.bf16.msra.mxu1 %v940_v54  ;;  %v735_v54 = vld [vmem:[%s1222_s8] ss:$0 sm:$0xff]  ;;  %s1011_s8 = scalar_lea.vmem %s694_s11, 512 }
 0x12b   :  { %893 = vmatprep.subr.bf16.mxu1 %v941_v55  ;;  %p1012_p10 = scmp.ne.s32.totalorder %s694_s11, %s1011_s8  ;;  %p1017_p12 = scmp.lt.s32.totalorder %s1011_s8, %s1011_s8 }
 0x12d   :  { %p1018_p13 = por %p1017_p12, %p1016_p11 }
 0x12e   :  { %894 = vmatpush3.bf16.msra.mxu1 %v941_v55 }
 0x12f   :  { %895 = vmatprep.subr.bf16.mxu1 %v942_v56  ;;  %p1019_p0 = pnand %p1018_p13, %p1012_p10 }
 0x132   :  { %896 = vmatpush3.bf16.msra.mxu1 %v942_v56 }
 0x133   :  { %897 = vmatprep.subr.bf16.mxu1 %v943_v22 }
 0x136   :  { %898 = vmatpush3.bf16.msra.mxu1 %v943_v22 }
 0x137   :  { %899 = vmatprep.subr.bf16.mxu1 %v944_v23 }
 0x13a   :  { %900 = vmatpush3.bf16.msra.mxu1 %v944_v23 }
 0x1f0   :  { %v855_v58 = vpop.f32.mrb[0].mxu1 }
 0x1f1   :  { %v330_v59 = vadd.f32 %v855_v58, %v717_v57  ;;  %v321_v60 = vpop.f32.mrb[1].mxu1 }
 0x1f2   :  { %v322_v61 = vadd.f32 %v717_v57, %v321_v60  ;;  %v856_v62 = vpop.f32.mrb[2].mxu1 }
 0x1f3   :  { %v333_v63 = vadd.f32 %v856_v62, %v717_v57  ;;  %v324_v0 = vpop.f32.mrb[3].mxu1  ;;  %v354_v2 = vmax.f32 %v330_v59, 0.0 }
 0x1f4   :  { %v325_v1 = vadd.f32 %v717_v57, %v324_v0  ;;  %v352_v4 = vmax.f32 %v322_v61, 0.0 }
 0x1f5   :  { %v355_v3 = vmax.f32 %v333_v63, 0.0 }
 0x1f6   :  { %v353_v5 = vmax.f32 %v325_v1, 0.0 }
 0x1f7   :  { %v361_v6 = vpack.c.bf16 %v355_v3, %v354_v2 }
 0x1f8   :  { %v360_v7 = vpack.c.bf16 %v353_v5, %v352_v4  ;;  %v859_v8 = vpop.f32.mrb[4].mxu1 }
 0x1f9   :  { %v346_v9 = vadd.f32 %v859_v8, %v717_v57  ;;  %v337_v10 = vpop.f32.mrb[5].mxu1 }
 0x1fa   :  { %v338_v11 = vadd.f32 %v717_v57, %v337_v10  ;;  %v860_v12 = vpop.f32.mrb[6].mxu1  ;;  %877 = vmatprep.mubr.bf16.mxu0 %v360_v7 }
 0x1fb   :  { %v349_v13 = vadd.f32 %v860_v12, %v717_v57  ;;  %v340_v14 = vpop.f32.mrb[7].mxu1  ;;  %878 = vmatmul.mubr.bf16.vlgmr.msra.gmra.mrb[8].mxu0 %v361_v6  ;;  %v358_v16 = vmax.f32 %v346_v9, 0.0 }
 0x1fc   :  { %v341_v15 = vadd.f32 %v717_v57, %v340_v14  ;;  %v356_v18 = vmax.f32 %v338_v11, 0.0 }
 0x1fd   :  { %v359_v17 = vmax.f32 %v349_v13, 0.0 }
 0x1fe   :  { %v357_v19 = vmax.f32 %v341_v15, 0.0 }
 0x1ff   :  { %v363_v20 = vpack.c.bf16 %v359_v17, %v358_v16 }
 0x200   :  { %v362_v21 = vpack.c.bf16 %v357_v19, %v356_v18 }
 0x202   :  { %881 = vmatprep.mubr.bf16.mxu0 %v362_v21 }
 0x203   :  { %882 = vmatmul.mubr.bf16.gmra.mrb[12].mxu0 %v363_v20 }
 0x2ce   :  { %v879_v25 = vpop.f32.mrb[8].mxu0 }
 0x2cf   :  { %v478_v26 = vadd.f32 %v879_v25, %v726_v24  ;;  %v469_v27 = vpop.f32.mrb[9].mxu0 }
 0x2d0   :  { %v470_v28 = vadd.f32 %v726_v24, %v469_v27  ;;  %v880_v29 = vpop.f32.mrb[10].mxu0 }
 0x2d1   :  { %v481_v30 = vadd.f32 %v880_v29, %v726_v24  ;;  %v472_v31 = vpop.f32.mrb[11].mxu0  ;;  %v502_v33 = vmax.f32 %v478_v26, 0.0 }
 0x2d2   :  { %v473_v32 = vadd.f32 %v726_v24, %v472_v31  ;;  %v500_v35 = vmax.f32 %v470_v28, 0.0 }
 0x2d3   :  { %v503_v34 = vmax.f32 %v481_v30, 0.0 }
 0x2d4   :  { %v501_v36 = vmax.f32 %v473_v32, 0.0 }
 0x2d5   :  { %v509_v37 = vpack.c.bf16 %v503_v34, %v502_v33 }
 0x2d6   :  { %v508_v38 = vpack.c.bf16 %v501_v36, %v500_v35  ;;  %v883_v39 = vpop.f32.mrb[12].mxu0 }
 0x2d7   :  { %v494_v40 = vadd.f32 %v883_v39, %v726_v24  ;;  %v485_v41 = vpop.f32.mrb[13].mxu0 }
 0x2d8   :  { %v486_v42 = vadd.f32 %v726_v24, %v485_v41  ;;  %v884_v43 = vpop.f32.mrb[14].mxu0  ;;  %901 = vmatprep.mubr.bf16.mxu1 %v508_v38 }
 0x2d9   :  { %v497_v44 = vadd.f32 %v884_v43, %v726_v24  ;;  %v488_v45 = vpop.f32.mrb[15].mxu0  ;;  %902 = vmatmul.mubr.bf16.vlgmr.msra.gmra.mrb[8].mxu1 %v509_v37  ;;  %v506_v47 = vmax.f32 %v494_v40, 0.0 }
 0x2da   :  { %v489_v46 = vadd.f32 %v726_v24, %v488_v45  ;;  %v504_v49 = vmax.f32 %v486_v42, 0.0 }
 0x2db   :  { %v507_v48 = vmax.f32 %v497_v44, 0.0 }
 0x2dc   :  { %v505_v50 = vmax.f32 %v489_v46, 0.0 }
 0x2dd   :  { %v511_v51 = vpack.c.bf16 %v507_v48, %v506_v47 }
 0x2de   :  { %v510_v52 = vpack.c.bf16 %v505_v50, %v504_v49 }
 0x2e0   :  { %905 = vmatprep.mubr.bf16.mxu1 %v510_v52 }
 0x2e1   :  { %906 = vmatmul.mubr.bf16.gmra.mrb[12].mxu1 %v511_v51 }
 0x3ac   :  { %v903_v53 = vpop.f32.mrb[8].mxu1 }
 0x3ad   :  { %v617_v55 = vpop.f32.mrb[9].mxu1  ;;  %v626_v57 = vadd.f32 %v903_v53, %v735_v54 }
 0x3ae   :  { %v904_v56 = vpop.f32.mrb[10].mxu1  ;;  %v618_v60 = vadd.f32 %v735_v54, %v617_v55 }
 0x3af   :  { %v629_v58 = vadd.f32 %v904_v56, %v735_v54  ;;  %v620_v59 = vpop.f32.mrb[11].mxu1 }
 0x3b0   :  { %v621_v61 = vadd.f32 %v735_v54, %v620_v59 }
 0x3b1   :  { %v768_v62 = vpack.c.bf16 %v629_v58, %v626_v57 }
 0x3b2   :  { %v763_v63 = vpack.c.bf16 %v621_v61, %v618_v60 }
 0x3b3   :  { %780 = vst [vmem:[#allocation8 + $0x8] sm:$0xff] %v768_v62  }
 0x3b4   :  { %764 = vst [vmem:[#allocation8] sm:$0xff] %v763_v63   ;;  %v907_v0 = vpop.f32.mrb[12].mxu1 }
 0x3b5   :  { %v633_v1 = vpop.f32.mrb[13].mxu1  ;;  %v642_v3 = vadd.f32 %v907_v0, %v735_v54 }
 0x3b6   :  { %v908_v2 = vpop.f32.mrb[14].mxu1  ;;  %v634_v6 = vadd.f32 %v735_v54, %v633_v1 }
 0x3b7   :  { %v645_v4 = vadd.f32 %v908_v2, %v735_v54  ;;  %v636_v5 = vpop.f32.mrb[15].mxu1 }
 0x3b8   :  { %v637_v7 = vadd.f32 %v735_v54, %v636_v5 }
 0x3b9   :  { %v778_v8 = vpack.c.bf16 %v645_v4, %v642_v3 }
 0x3ba   :  { %v773_v9 = vpack.c.bf16 %v637_v7, %v634_v6 }
 0x3bb   :  { %782 = vst [vmem:[#allocation8 + $0x18] sm:$0xff] %v778_v8  }
 0x3bc   :  { %781 = vst [vmem:[#allocation8 + $0x10] sm:$0xff] %v773_v9  }
 0x3bd   :  { %1022 = shalt.err (!%p1019_p0)
}
 0x3be   :  { %s1023_s3 = scalar_lea.hbm %s1223_s9, 512 }
 0x3bf   :  { %p1024_p1 = scmp.ne.s32.totalorder %s1223_s9, %s1023_s3  ;;  %p1027_p2 = scmp.lt.u32.totalorder %s1023_s3, %s1223_s9 }
 0x3c1   :  { %p1029_p3 = pnand %p1027_p2, %p1024_p1 }
 0x3c3   :  { %1032 = shalt.err (!%p1029_p3)
}
 0x3c4   :  { %699 = dma.vmem_to_hbm [thread:$0]  %s694_s11, 512, %s1223_s9, [#allocation4], %s1041_s21, %s1041_s21, %s1042_s22  }
 0x3c5   :  { %1037 = dma.done.wait [#allocation4], 512  }
 0x3c6   :  { %1038 = vsyncadd [#allocation4], 4294966784 }
 0x3c7   :  { %703 = vsyncpa [#allocation3], 1 }
 0x3c8   :  { %704 = vsyncpa [#allocation6], 1 }
 0x3c9   :  { %705 = vsyncpa [#allocation4], 1 }

</bundles_post_ra>
